<compile_context>
chip_gen: v5e
topology: v5e:2x2
jax: 0.10.0
libtpu: 0.0.40
codegen_flags: <defaults>
</compile_context>

<pallas_src>
import jax
import jax.numpy as jnp
from jax.experimental import pallas as pl
from jax.experimental.pallas import tpu as pltpu


def _round_up(x, m):
    return ((x + m - 1) // m) * m


def _projection_kernel(x_ref, w_ref, b_ref, o_ref):
    # x_ref: (TM, K)  activations in their HBM dtype (cast on the fly)
    # w_ref: (K, Op)  packed weights (compute dtype), VMEM-resident
    # b_ref: (1, Op)  combined bias, f32
    # o_ref: (TM, Op)
    x = x_ref[...].astype(w_ref.dtype)          # in-kernel cast (VPU, hidden under MXU)
    acc = jnp.dot(x, w_ref[...], preferred_element_type=jnp.float32)
    o_ref[...] = (acc + b_ref[...]).astype(o_ref.dtype)


def pack_projection_params(w1, b1, w2, b2, *, compute_dtype=jnp.bfloat16):
    """One-time packing of the two nn.Linear params (call at load time).

    out = x @ [w1.T ; w2.T] + (b1 + b2)
    Only the output axis is zero-padded to a lane multiple (128).  K stays 2H,
    matching the unpadded activations exactly (pad both or neither).
    Returns (W_packed (2H, Op), bias (1, Op) f32, out_features).
    """
    O, H = w1.shape
    assert w2.shape == (O, H)
    Op = _round_up(O, 128)
    W = jnp.concatenate([w1.T, w2.T], axis=0)                       # (2H, O)
    W_p = jnp.zeros((2 * H, Op), compute_dtype).at[:, :O].set(W.astype(compute_dtype))
    b_p = jnp.zeros((1, Op), jnp.float32).at[:, :O].set(
        (b1 + b2).reshape(1, O).astype(jnp.float32))
    return W_p, b_p, O


def projection_forward(x, W_p, b_p, out_features, *, tile_m=1024, out_dtype=None):
    """x: (B, T, 2H).  W_p/b_p from pack_projection_params.  Returns (B, T, O)."""
    B, T, K = x.shape
    Kw, Op = W_p.shape
    assert K == Kw, "activation feature dim (2H) must match packed weight K"
    O = out_features
    out_dtype = x.dtype if out_dtype is None else out_dtype

    M = B * T
    x2d = x.reshape(M, K)                       # free reshape; no pad, no copy

    x_isz = jnp.dtype(x.dtype).itemsize
    w_isz = jnp.dtype(W_p.dtype).itemsize
    o_isz = jnp.dtype(out_dtype).itemsize

    VMEM_BUDGET = 48 * 1024 * 1024              # conservative vs v7x 64 MiB/TC

    def working_set(tm):
        # double-buffered x / out tiles + resident weights (2x buffers) + bias
        return (2 * tm * K * x_isz + 2 * tm * Op * o_isz
                + 2 * K * Op * w_isz + 2 * Op * 4)

    if M <= 8:
        TM = M                                  # single full-extent row block
    else:
        TM = min(tile_m, _round_up(M, 8))
        if pl.cdiv(M, TM) < 2:                  # >= 2 grid steps -> both v7x TCs
            TM = max(8, _round_up(pl.cdiv(M, 2), 8))
        while TM > 8 and working_set(TM) > VMEM_BUDGET:
            TM = max(8, _round_up(TM // 2, 8))

    grid = (pl.cdiv(M, TM),)

    flops = 2 * M * K * O
    bytes_accessed = (M * K * x_isz            # activations, read once
                      + K * Op * w_isz         # weights, fetched once
                      + M * Op * o_isz         # output
                      + Op * 4)                # bias
    vmem_limit = int(min(VMEM_BUDGET, max(8 * 1024 * 1024, 2 * working_set(TM))))

    out_p = pl.pallas_call(
        _projection_kernel,
        out_shape=jax.ShapeDtypeStruct((M, Op), out_dtype),
        grid_spec=pltpu.PrefetchScalarGridSpec(
            num_scalar_prefetch=0,
            grid=grid,
            in_specs=[
                pl.BlockSpec((TM, K), lambda i: (i, 0)),    # row tile of x (unpadded K)
                pl.BlockSpec((K, Op), lambda i: (0, 0)),    # resident weights
                pl.BlockSpec((1, Op), lambda i: (0, 0)),    # resident bias
            ],
            out_specs=pl.BlockSpec((TM, Op), lambda i: (i, 0)),
        ),
        compiler_params=pltpu.CompilerParams(
            dimension_semantics=("parallel",),
            vmem_limit_bytes=vmem_limit),
        cost_estimate=pl.CostEstimate(
            flops=flops, transcendentals=0, bytes_accessed=bytes_accessed),
    )(x2d, W_p, b_p)

    out = out_p if Op == O else out_p[:, :O]    # no-op when O % 128 == 0
    return out.reshape(B, T, O)


def projection_apply(x, w1, b1, w2, b2, *, compute_dtype=jnp.bfloat16, **kwargs):
    """Convenience wrapper matching the PyTorch module call (packs per call)."""
    W_p, b_p, O = pack_projection_params(w1, b1, w2, b2, compute_dtype=compute_dtype)
    return projection_forward(x, W_p, b_p, O, **kwargs)


def _torch_linear_init(key, out_features, in_features):
    # Matches nn.Linear default init: U(-1/sqrt(in), 1/sqrt(in)) for W and b.
    kw, kb = jax.random.split(key)
    bound = 1.0 / (in_features ** 0.5)
    w = jax.random.uniform(kw, (out_features, in_features),
                           minval=-bound, maxval=bound, dtype=jnp.float32)
    b = jax.random.uniform(kb, (out_features,),
                           minval=-bound, maxval=bound, dtype=jnp.float32)
    return w, b


if __name__ == "__main__":
    key = jax.random.PRNGKey(0)
    k_x, k_l1, k_l2 = jax.random.split(key, 3)

    batch, seq = 2, 8
    hidden_size, output_size = 32, 32

    x = jax.random.normal(k_x, (batch, seq, 2 * hidden_size), dtype=jnp.float32)
    w1, b1 = _torch_linear_init(k_l1, output_size, hidden_size)
    w2, b2 = _torch_linear_init(k_l2, output_size, hidden_size)

    # Pure-JAX reference of the forward semantics (f32).
    fwd_h, bwd_h = jnp.split(x, 2, axis=-1)
    ref = fwd_h @ w1.T + b1 + bwd_h @ w2.T + b2

    # Exact f32 path: weights packed once in f32, tight tolerance.
    W32, bias32, O = pack_projection_params(w1, b1, w2, b2,
                                            compute_dtype=jnp.float32)
    out_f32 = jax.block_until_ready(projection_forward(x, W32, bias32, O))
    assert out_f32.shape == (batch, seq, output_size)
    assert jnp.allclose(out_f32, ref, atol=1e-4, rtol=1e-4)

    # Default fast path: bf16 packed weights, in-kernel bf16 activation cast,
    # f32 accumulation (MXU peak dtype on v6e/v7x).
    Wbf, biasbf, O = pack_projection_params(w1, b1, w2, b2)
    out_bf16 = jax.block_until_ready(projection_forward(x, Wbf, biasbf, O))
    assert out_bf16.shape == (batch, seq, output_size)
    assert jnp.allclose(out_bf16, ref, atol=2e-2, rtol=2e-2)

    print("KERNEL_OK")
</pallas_src>

<mosaic_0001>
module attributes {stable_mosaic.version = 11 : i64} {
  func.func @_projection_kernel(%arg0: i32, %arg1: memref<8x64xf32, #tpu.memory_space<vmem>>, %arg2: memref<64x128xf32, #tpu.memory_space<vmem>>, %arg3: memref<1x128xf32, #tpu.memory_space<vmem>>, %arg4: memref<8x128xf32, #tpu.memory_space<vmem>>) attributes {dimension_semantics = [#tpu.dimension_semantics<parallel>], iteration_bounds = array<i64: 2>, scalar_prefetch = 0 : i64, scratch_operands = 0 : i64, tpu.core_type = #tpu.core_type<tc>, window_params = [{transform_indices = @transform_0, window_bounds = array<i64: 8, 64>}, {pipeline_mode = #tpu.pipeline_mode<synchronous>, transform_indices = @transform_1, window_bounds = array<i64: 64, 128>}, {pipeline_mode = #tpu.pipeline_mode<synchronous>, transform_indices = @transform_2, window_bounds = array<i64: 1, 128>}, {transform_indices = @transform_3, window_bounds = array<i64: 8, 128>}]} {
    %c0 = arith.constant 0 : index
    %c0_0 = arith.constant 0 : index
    %0 = vector.load %arg1[%c0, %c0_0] : memref<8x64xf32, #tpu.memory_space<vmem>>, vector<8x64xf32>
    %c0_1 = arith.constant 0 : index
    %c0_2 = arith.constant 0 : index
    %1 = vector.load %arg2[%c0_1, %c0_2] : memref<64x128xf32, #tpu.memory_space<vmem>>, vector<64x128xf32>
    %cst = arith.constant dense<0.000000e+00> : vector<8x128xf32>
    %2 = tpu.matmul %0, %1, %cst {dimension_numbers = #tpu.dot_dimension_numbers<[1], [0], [0], [1], [0, 0, 1, 1], [], []>} : vector<8x64xf32>, vector<64x128xf32>, vector<8x128xf32> -> vector<8x128xf32>
    %c0_3 = arith.constant 0 : index
    %c0_4 = arith.constant 0 : index
    %3 = vector.load %arg3[%c0_3, %c0_4] : memref<1x128xf32, #tpu.memory_space<vmem>>, vector<1x128xf32>
    %4 = vector.broadcast %3 : vector<1x128xf32> to vector<8x128xf32>
    %5 = arith.addf %2, %4 : vector<8x128xf32>
    %c0_5 = arith.constant 0 : index
    %c0_6 = arith.constant 0 : index
    %6 = vector.load %arg4[%c0_5, %c0_6] : memref<8x128xf32, #tpu.memory_space<vmem>>, vector<8x128xf32>
    tpu.vector_store %arg4[%c0_5, %c0_6], %5 {strides = array<i32>} : memref<8x128xf32, #tpu.memory_space<vmem>>, vector<8x128xf32>,
    return
  }
  func.func @transform_0(%arg0: i32) -> (i32, i32) {
    %c0_i32 = arith.constant 0 : i32
    %c0_i32_0 = arith.constant 0 : i32
    return %arg0, %c0_i32 : i32, i32
  }
  func.func @transform_1(%arg0: i32) -> (i32, i32) {
    %c0_i32 = arith.constant 0 : i32
    %c0_i32_0 = arith.constant 0 : i32
    %c0_i32_1 = arith.constant 0 : i32
    return %c0_i32, %c0_i32_0 : i32, i32
  }
  func.func @transform_2(%arg0: i32) -> (i32, i32) {
    %c0_i32 = arith.constant 0 : i32
    %c0_i32_0 = arith.constant 0 : i32
    %c0_i32_1 = arith.constant 0 : i32
    return %c0_i32, %c0_i32_0 : i32, i32
  }
  func.func @transform_3(%arg0: i32) -> (i32, i32) {
    %c0_i32 = arith.constant 0 : i32
    %c0_i32_0 = arith.constant 0 : i32
    return %arg0, %c0_i32 : i32, i32
  }
}

</mosaic_0001>

<bundles_post_ra>
// kernel: tpu_custom_call.1
= control target key start
LH: loop header
LB: loop body
LE: loop exit
PB: predicated region body
PF: predicated region fallthrough
CT: control target
= control target key end

     0   :  { %8 = vsyncpa [#allocation3], 0  ;;  %s708_s0 = inlined_call_operand.hbm [shape: f32[16,64], index: 0, kind: input, shape index: {}]   ;;  %s709_s1 = inlined_call_operand.hbm [shape: f32[64,128], index: 1, kind: input, shape index: {}]   ;;  %s710_s2 = inlined_call_operand.vmem [shape: f32[1,128], index: 2, kind: input, shape index: {}]   ;;  %s711_s3 = inlined_call_operand.hbm [shape: f32[16,128], index: 3, kind: output, shape index: {}]  }
   0x1   :  { %10 = vsyncpa [#allocation3 + $0x1], 0 }
   0x2   :  { %11 = vsyncpa [#allocation6], 0 }
   0x3   :  { %12 = vsyncpa [#allocation4], 0 }
   0x4   :  { %14 = vsyncpa [#allocation4 + $0x1], 0  ;;  %s569_s12 = smov 0   ;;  %s571_s13 = smov 0  }
   0x5   :  { %s573_s14 = smov 0   ;;  %s575_s15 = smov 0  }
   0x6 LB: > { %s130_s18 = sshll.u32 %s709_s1, 4  ;;  %s593_s19 = sadd.s32 4294967295, %s544_s15   ;;  %s544_s15 = sphi %s575_s15, %s721_s15   ;;  %s540_s14 = sphi %s573_s14, %s720_s14   ;;  %s536_s13 = sphi %s571_s13, %s719_s13   ;;  %s532_s12 = sphi %s569_s12, %s718_s12   ;;  %s131_s18 = int_to_ptr.hbm [resolvable:$true] %s130_s18 }
   0x7   : > { %p340_p0 = scmp.ge.s32.totalorder %s544_s15, 1  ;;  %p41_p1 = scmp.eq.s32.totalorder %s593_s19, 0 }
   0x8   : > { %p119_p2 = scmp.lt.s32.totalorder %s544_s15, 3  ;;  %s546_s21 = smov [#allocation5]  }
   0x9   : > { %s132_s22 = sshll.u32 %s546_s21, 4  ;;  %s547_s23 = smov 128   ;;  %s133_s22 = int_to_ptr.vmem [resolvable:$true] %s132_s22 }
   0xa   : > { %p598_p3 = pnand %p340_p0, %p119_p2  ;;  %s548_s24 = smov 8  }
   0xb   : > { %s339_s25 = sadd.s32 4294967294, %s544_s15   ;;  %s609_s26 = sadd.s32 1, %s544_s15  }
   0xc   : > { %p362_p4 = pneg %p598_p3  ;;  %s27_s27 = sadd.s32 1, %s540_s14 }
   0xd   : > { %s24_s28 = ssub.s32 %s544_s15, %s609_s26  ;;  %p34_p7 = scmp.ne.s32.totalorder %s540_s14, %s536_s13 }
   0xe   : > { %p363_p6 = pnand %p362_p4, %p41_p1  ;;  %p25_p8 = scmp.eq.s32.totalorder %s24_s28, 0 }
   0xf   : > { %p35_p9 = scmp.eq.s32.totalorder %s544_s15, 0  ;;  %p40_p10 = scmp.ne.s32.totalorder %s536_s13, %s532_s12 }
  0x10   : > { %365 = dma.hbm_to_vmem [thread:$0]  (!%p363_p6), %s131_s18, 1024, %s133_s22, [#allocation6], %s547_s23, %s547_s23, %s548_s24  }
  0x11   : > { %p106_p11 = scmp.eq.s32.totalorder %s593_s19, 1  ;;  %p625_p12 = por %p41_p1, %p40_p10 }
  0x12   : > { %s621_s29 = scalar_select %p25_p8, %s540_s14, %s27_s27  }
  0x13   : > { %p629_p13 = por %p106_p11, %p34_p7  ;;  %p112_p0 = scmp.eq.s32.totalorder %s339_s25, 1 }
  0x14   : > { %p36_p2 = por %p35_p9, %p34_p7  ;;  %s149_s5 = sand.u32 1, %s540_s14  }
  0x15   : > { %p634_p4 = por %p112_p0, %p40_p10  ;;  %p375_p6 = scmp.lt.s32.totalorder %s544_s15, 2 }
  0x16   : > { %s343_s7 = sshll.u32 %s149_s5, 3  ;;  %s344_s8 = sshll.u32 %s544_s15, 3 }
  0x17   : > { %s157_s11 = scalar_lea.hbm %s708_s0, %s344_s8  ;;  %s153_s17 = scalar_lea.vmem [#allocation2], %s343_s7 }
  0x18   : > { %s159_s16 = sshll.u32 %s157_s11, 4  ;;  %s161_s18 = sshll.u32 %s153_s17, 4  ;;  %s160_s16 = int_to_ptr.hbm [resolvable:$true] %s159_s16  ;;  %s162_s18 = int_to_ptr.vmem [resolvable:$true] %s161_s18 }
  0x19   : > { %p643_p8 = pnand %p375_p6, %p36_p2  ;;  %s150_s22 = scalar_lea.sflag [#allocation3], %s149_s5 }
  0x1a   : > { %s444_s23 = sshra.s32 %s160_s16, 4  ;;  %s451_s28 = scalar_lea.hbm %s708_s0, 16  ;;  %s445_s23 = int_to_ptr.hbm [resolvable:$true] %s444_s23 }
  0x1b   : > { %s446_s24 = scalar_lea.hbm %s445_s23, 8  ;;  %p448_p9 = pneg %p643_p8 }
  0x1c   : > { %p447_p7 = scmp.ne.s32.totalorder %s445_s23, %s446_s24  ;;  %p452_p0 = scmp.lt.s32.totalorder %s445_s23, %s708_s0 }
  0x1d   : > { %p453_p2 = scmp.lt.s32.totalorder %s451_s28, %s446_s24 }
  0x1e   : > { %p449_p10 = pnand %p448_p9, %p447_p7 }
  0x1f   : > { %p454_p6 = por %p453_p2, %p452_p0 }
  0x20   : > { %p450_p11 = pneg %p449_p10 }
  0x22   : > { %p455_p5 = pnand %p454_p6, %p450_p11 }
  0x24   : > { %458 = shalt.err (!%p455_p5)
}
  0x25   : > { %369 = dma.hbm_to_vmem [thread:$0]  (!%p643_p8), %s160_s16, 128, %s162_s18, %s150_s22  }
  0x26   : > { %170 = sbr.rel (%p598_p3) target bundleno = 193 (0xc1), region = 32  ;;  %s660_s5 = sand.u32 (!%p598_p3), 1, %s536_s13  }
  0x27   : > { %s346_s9 = sshll.u32 (!%p598_p3), %s660_s5, 3  ;;  %s173_s10 = scalar_lea.sflag (!%p598_p3), [#allocation3], %s660_s5 }
  0x28   : > { %s176_s11 = scalar_lea.vmem (!%p598_p3), [#allocation2], %s346_s9 }
  0x2b   : > { %519 = dma.done.wait (%p625_p12), %s173_s10, 128  }
  0x2c   : > { %521 = vsyncadd (%p625_p12), %s173_s10, 4294967168 }
  0x2d   : > { %523 = dma.done.wait (%p41_p1), [#allocation6], 1024  }
  0x2e   : > { %525 = vsyncadd (%p41_p1), [#allocation6], 4294966272  ;;  %v213_v0 = vld [vmem:[#allocation5 + $0x38] sm:$0xff]  ;;  %v212_v1 = vld [vmem:[#allocation5 + $0x30] sm:$0xff]  ;;  %vm218_vm0 = vcmask 523264   ;;  %s351_s20 = sshll.u32 %s593_s19, 3 }
  0x2f   : > { %230 = vmatpush.msra.mxu0 %v213_v0  ;;  %v211_v2 = vld [vmem:[#allocation5 + $0x28] sm:$0xff]  ;;  %v210_v3 = vld [vmem:[#allocation5 + $0x20] sm:$0xff]  ;;  %v209_v4 = vld [vmem:[#allocation5 + $0x18] sm:$0xff]  ;;  %s254_s17 = scalar_lea.hbm %s711_s3, %s351_s20  ;;  %s204_s22 = scalar_lea.vmem [#allocation7], %s346_s9 }
  0x30   : > { %v208_v5 = vld [vmem:[#allocation5 + $0x10] sm:$0xff]  ;;  %v207_v6 = vld [vmem:[#allocation5 + $0x8] sm:$0xff]  ;;  %v206_v7 = vld [vmem:[#allocation5] sm:$0xff]  ;;  %s256_s23 = sshll.u32 %s204_s22, 4  ;;  %s258_s24 = sshll.u32 %s254_s17, 4  ;;  %s257_s23 = int_to_ptr.vmem [resolvable:$true] %s256_s23  ;;  %s259_s24 = int_to_ptr.hbm [resolvable:$true] %s258_s24 }
  0x31   : > { %231 = vmatpush.msra.mxu0 %v212_v1  ;;  %v205_v8 = vld [vmem:[%s176_s11] sm:$0xff]  ;;  %s244_s25 = scalar_lea.sflag [#allocation4], %s660_s5  ;;  %s488_s27 = sshra.s32 %s259_s24, 4  ;;  %s489_s27 = int_to_ptr.hbm [resolvable:$true] %s488_s27 }
  0x32   : > { %v413_v9 = vld [vmem:[%s710_s2] ss:$0 sm:$0xff]  ;;  %s490_s19 = scalar_lea.hbm %s489_s27, 8  ;;  %s494_s8 = scalar_lea.hbm %s711_s3, 16 }
  0x33   : > { %232 = vmatpush.msra.mxu0 %v211_v2  ;;  %p491_p1 = scmp.ne.s32.totalorder %s489_s27, %s490_s19  ;;  %p495_p12 = scmp.lt.s32.totalorder %s489_s27, %s711_s3 }
  0x34   : > { %p496_p8 = scmp.lt.s32.totalorder %s494_s8, %s490_s19 }
  0x35   : > { %233 = vmatpush.msra.mxu0 %v210_v3  ;;  %p492_p3 = pnand %p491_p1, %p629_p13 }
  0x36   : > { %p497_p7 = por %p496_p8, %p495_p12 }
  0x37   : > { %234 = vmatpush.msra.mxu0 %v209_v4  ;;  %p493_p5 = pneg %p492_p3 }
  0x39   : > { %235 = vmatpush.msra.mxu0 %v208_v5  ;;  %p498_p9 = pnand %p497_p7, %p493_p5 }
  0x3b   : > { %236 = vmatpush.msra.mxu0 %v207_v6 }
  0x3d   : > { %237 = vmatpush.msra.mxu0 %v206_v7 }
  0x3e   : > { %349 = vmatmul.msk.f32.vlgmr.msra.gmra.mxu0 %vm218_vm0, %v205_v8 }
  0xbb   : > { %v239_v10 = vpop.f32.mrf.mxu0 }
  0xbc   : > { %v240_v11 = vadd.f32 %v413_v9, %v239_v10 }
  0xbe   : > { %242 = vst [vmem:[%s204_s22] sm:$0xff] %v240_v11 }
  0xbf   : > { %501 = shalt.err (!%p498_p9)
}
  0xc0   : > { %360 = dma.vmem_to_hbm [thread:$0]  (%p629_p13), %s257_s23, 128, %s259_s24, %s244_s25  }
  0xc1 PF: > { %s270_s5 = sand.u32 1, %s532_s12   ;;  %p717_p10 = scmp.ge.s32.totalorder %s544_s15, 2 }
  0xc2   : > { %s271_s11 = scalar_lea.sflag [#allocation4], %s270_s5 }
  0xc3   : > { %p371_p11 = pnand %p717_p10, %p634_p4 }
  0xc5   : > { %p372_p0 = pneg %p371_p11 }
  0xc7   : > { %527 = dma.done.wait (%p372_p0), %s271_s11, 128  }
  0xc8   : > { %529 = vsyncadd (%p372_p0), %s271_s11, 4294967168  ;;  %p17_p2 = scmp.ge.s32.totalorder %s609_s26, 4   ;;  %s718_s12 = smov %s536_s13 }
  0xc9   : > { %s719_s13 = smov %s540_s14  ;;  %s720_s14 = smov %s621_s29 }
  0xca   : > { %s721_s15 = smov %s609_s26  ;;  %19 = sbr.rel (!%p17_p2) target bundleno = 6 (0x6), region = 81 }
  0xcf   :  { %277 = vsyncpa [#allocation3], 1 }
  0xd0   :  { %279 = vsyncpa [#allocation3 + $0x1], 1 }
  0xd1   :  { %280 = vsyncpa [#allocation6], 1 }
  0xd2   :  { %281 = vsyncpa [#allocation4], 1 }
  0xd3   :  { %283 = vsyncpa [#allocation4 + $0x1], 1 }

</bundles_post_ra>
